<compile_context>
chip_gen: v6e
topology: v6e:2x2x1
jax: 0.10.0
libtpu: 0.0.40
codegen_flags: <defaults>
</compile_context>

<pallas_src>
import jax
import jax.numpy as jnp
from jax.experimental import pallas as pl
from jax.experimental.pallas import tpu as pltpu

HIDDEN = 24  # matches torch.nn.Linear(n_obs, 24) / Linear(24, 24)


def _mlp_kernel(x_ref, w1_ref, b1_ref, w2_ref, b2_ref, w3_ref, b3_ref, o_ref):
    # x_ref: (n_obs, TB) -- batch on lanes.
    x = x_ref[...]
    # fc1 + relu: (24, n_obs) @ (n_obs, TB) -> (24, TB)
    h1 = jnp.dot(w1_ref[...], x, preferred_element_type=jnp.float32) + b1_ref[...]
    h1 = jnp.maximum(h1, 0.0)
    # fc2 + relu: (24, 24) @ (24, TB) -> (24, TB)
    h2 = jnp.dot(w2_ref[...], h1, preferred_element_type=jnp.float32) + b2_ref[...]
    h2 = jnp.maximum(h2, 0.0)
    # fc3 (no activation): (n_acs, 24) @ (24, TB) -> (n_acs, TB)
    o_ref[...] = (jnp.dot(w3_ref[...], h2, preferred_element_type=jnp.float32)
                  + b3_ref[...]).astype(o_ref.dtype)


def prepare_params(params):
    """One-time preprocessing (hoisted out of the per-call path):
    keep torch-convention (out, in) weights, make biases column vectors (out, 1)."""
    return dict(
        w1=params["w1"], b1=params["b1"].reshape(-1, 1),
        w2=params["w2"], b2=params["b2"].reshape(-1, 1),
        w3=params["w3"], b3=params["b3"].reshape(-1, 1),
    )


def mlp_forward(x, prepared, *, tb_max=1024):
    """x: (batch, n_obs) float32. prepared: output of prepare_params()."""
    w1, b1 = prepared["w1"], prepared["b1"]
    w2, b2 = prepared["w2"], prepared["b2"]
    w3, b3 = prepared["w3"], prepared["b3"]

    batch, n_obs = x.shape
    n_acs = w3.shape[0]

    # Batch tile: either the full (small) batch, or a multiple-of-128 tile
    # (lane-axis block constraint: divisible by 128 or equal to full extent).
    if batch <= tb_max:
        tb = batch
        padded = batch
    else:
        tb = tb_max
        padded = pl.cdiv(batch, tb) * tb

    x_t = x.T  # (n_obs, batch) -- batch on lanes
    if padded != batch:
        x_t = jnp.pad(x_t, ((0, 0), (0, padded - batch)))

    num_blocks = padded // tb

    grid_spec = pltpu.PrefetchScalarGridSpec(
        num_scalar_prefetch=0,
        grid=(num_blocks,),
        in_specs=[
            pl.BlockSpec((n_obs, tb), lambda i: (0, i)),     # activations: tiled over batch
            pl.BlockSpec(w1.shape, lambda i: (0, 0)),        # weights/biases: VMEM-resident
            pl.BlockSpec(b1.shape, lambda i: (0, 0)),
            pl.BlockSpec(w2.shape, lambda i: (0, 0)),
            pl.BlockSpec(b2.shape, lambda i: (0, 0)),
            pl.BlockSpec(w3.shape, lambda i: (0, 0)),
            pl.BlockSpec(b3.shape, lambda i: (0, 0)),
        ],
        out_specs=pl.BlockSpec((n_acs, tb), lambda i: (0, i)),
    )

    out_t = pl.pallas_call(
        _mlp_kernel,
        out_shape=jax.ShapeDtypeStruct((n_acs, padded), jnp.float32),
        grid_spec=grid_spec,
        compiler_params=pltpu.CompilerParams(
            dimension_semantics=("parallel",),     # shard batch across TCs on v7x
            vmem_limit_bytes=32 * 1024 * 1024,     # explicit; tiles are tiny on all gens
        ),
    )(x_t, w1, b1, w2, b2, w3, b3)

    out = out_t.T  # back to (batch, n_acs) to preserve the module's API
    if padded != batch:
        out = out[:batch]
    return out


def init_params(key, n_obs, n_acs):
    """Deterministic synthetic init mimicking torch.nn.Linear shapes (out, in)."""
    ks = jax.random.split(key, 6)

    def lin(kw, kb, fan_in, fan_out):
        bound = 1.0 / jnp.sqrt(fan_in)
        w = jax.random.uniform(kw, (fan_out, fan_in), jnp.float32, -bound, bound)
        b = jax.random.uniform(kb, (fan_out,), jnp.float32, -bound, bound)
        return w, b

    w1, b1 = lin(ks[0], ks[1], n_obs, HIDDEN)
    w2, b2 = lin(ks[2], ks[3], HIDDEN, HIDDEN)
    w3, b3 = lin(ks[4], ks[5], HIDDEN, n_acs)
    return dict(w1=w1, b1=b1, w2=w2, b2=b2, w3=w3, b3=b3)


def mlp_reference(x, p):
    h1 = jnp.maximum(x @ p["w1"].T + p["b1"], 0.0)
    h2 = jnp.maximum(h1 @ p["w2"].T + p["b2"], 0.0)
    return h2 @ p["w3"].T + p["b3"]


if __name__ == "__main__":
    key = jax.random.PRNGKey(0)
    k_x, k_x2, k_p = jax.random.split(key, 3)

    n_obs, n_acs = 4, 2  # small CartPole-like env shapes
    params = init_params(k_p, n_obs, n_acs)
    prepared = prepare_params(params)

    # Small batch: single grid step (tile == full batch extent).
    batch = 8
    x = jax.random.normal(k_x, (batch, n_obs), jnp.float32)
    out = mlp_forward(x, prepared)
    jax.block_until_ready(out)
    ref = mlp_reference(x, params)
    assert out.shape == (batch, n_acs)
    assert jnp.allclose(out, ref, atol=1e-5, rtol=1e-5), "mismatch vs reference (small batch)"

    # Larger batch: exercises the pipelined batch grid + padding/slice path.
    batch2 = 200
    x2 = jax.random.normal(k_x2, (batch2, n_obs), jnp.float32)
    out2 = mlp_forward(x2, prepared, tb_max=128)
    jax.block_until_ready(out2)
    ref2 = mlp_reference(x2, params)
    assert out2.shape == (batch2, n_acs)
    assert jnp.allclose(out2, ref2, atol=1e-5, rtol=1e-5), "mismatch vs reference (tiled batch)"

    print("KERNEL_OK")
</pallas_src>

<mosaic_0001>
module attributes {stable_mosaic.version = 11 : i64} {
  func.func @_mlp_kernel(%arg0: i32, %arg1: memref<4x8xf32, #tpu.memory_space<vmem>>, %arg2: memref<24x4xf32, #tpu.memory_space<vmem>>, %arg3: memref<24x1xf32, #tpu.memory_space<vmem>>, %arg4: memref<24x24xf32, #tpu.memory_space<vmem>>, %arg5: memref<24x1xf32, #tpu.memory_space<vmem>>, %arg6: memref<2x24xf32, #tpu.memory_space<vmem>>, %arg7: memref<2x1xf32, #tpu.memory_space<vmem>>, %arg8: memref<2x8xf32, #tpu.memory_space<vmem>>) attributes {dimension_semantics = [#tpu.dimension_semantics<parallel>], iteration_bounds = array<i64: 1>, scalar_prefetch = 0 : i64, scratch_operands = 0 : i64, tpu.core_type = #tpu.core_type<tc>, window_params = [{transform_indices = @transform_0, window_bounds = array<i64: 4, 8>}, {pipeline_mode = #tpu.pipeline_mode<synchronous>, transform_indices = @transform_1, window_bounds = array<i64: 24, 4>}, {pipeline_mode = #tpu.pipeline_mode<synchronous>, transform_indices = @transform_2, window_bounds = array<i64: 24, 1>}, {pipeline_mode = #tpu.pipeline_mode<synchronous>, transform_indices = @transform_3, window_bounds = array<i64: 24, 24>}, {pipeline_mode = #tpu.pipeline_mode<synchronous>, transform_indices = @transform_4, window_bounds = array<i64: 24, 1>}, {pipeline_mode = #tpu.pipeline_mode<synchronous>, transform_indices = @transform_5, window_bounds = array<i64: 2, 24>}, {pipeline_mode = #tpu.pipeline_mode<synchronous>, transform_indices = @transform_6, window_bounds = array<i64: 2, 1>}, {transform_indices = @transform_7, window_bounds = array<i64: 2, 8>}]} {
    %c0 = arith.constant 0 : index
    %c0_0 = arith.constant 0 : index
    %0 = vector.load %arg1[%c0, %c0_0] : memref<4x8xf32, #tpu.memory_space<vmem>>, vector<4x8xf32>
    %c0_1 = arith.constant 0 : index
    %c0_2 = arith.constant 0 : index
    %1 = vector.load %arg2[%c0_1, %c0_2] : memref<24x4xf32, #tpu.memory_space<vmem>>, vector<24x4xf32>
    %cst = arith.constant dense<0.000000e+00> : vector<24x8xf32>
    %2 = tpu.matmul %1, %0, %cst {dimension_numbers = #tpu.dot_dimension_numbers<[1], [0], [0], [1], [0, 0, 1, 1], [], []>} : vector<24x4xf32>, vector<4x8xf32>, vector<24x8xf32> -> vector<24x8xf32>
    %c0_3 = arith.constant 0 : index
    %c0_4 = arith.constant 0 : index
    %3 = vector.load %arg3[%c0_3, %c0_4] : memref<24x1xf32, #tpu.memory_space<vmem>>, vector<24x1xf32>
    %4 = vector.broadcast %3 : vector<24x1xf32> to vector<24x8xf32>
    %5 = arith.addf %2, %4 : vector<24x8xf32>
    %cst_5 = arith.constant 0.000000e+00 : f32
    %6 = vector.broadcast %cst_5 : f32 to vector<24x8xf32>
    %7 = arith.maximumf %5, %6 : vector<24x8xf32>
    %c0_6 = arith.constant 0 : index
    %c0_7 = arith.constant 0 : index
    %8 = vector.load %arg4[%c0_6, %c0_7] : memref<24x24xf32, #tpu.memory_space<vmem>>, vector<24x24xf32>
    %cst_8 = arith.constant dense<0.000000e+00> : vector<24x8xf32>
    %9 = tpu.matmul %8, %7, %cst_8 {dimension_numbers = #tpu.dot_dimension_numbers<[1], [0], [0], [1], [0, 0, 1, 1], [], []>} : vector<24x24xf32>, vector<24x8xf32>, vector<24x8xf32> -> vector<24x8xf32>
    %c0_9 = arith.constant 0 : index
    %c0_10 = arith.constant 0 : index
    %10 = vector.load %arg5[%c0_9, %c0_10] : memref<24x1xf32, #tpu.memory_space<vmem>>, vector<24x1xf32>
    %11 = vector.broadcast %10 : vector<24x1xf32> to vector<24x8xf32>
    %12 = arith.addf %9, %11 : vector<24x8xf32>
    %cst_11 = arith.constant 0.000000e+00 : f32
    %13 = vector.broadcast %cst_11 : f32 to vector<24x8xf32>
    %14 = arith.maximumf %12, %13 : vector<24x8xf32>
    %c0_12 = arith.constant 0 : index
    %c0_13 = arith.constant 0 : index
    %15 = vector.load %arg6[%c0_12, %c0_13] : memref<2x24xf32, #tpu.memory_space<vmem>>, vector<2x24xf32>
    %cst_14 = arith.constant dense<0.000000e+00> : vector<2x8xf32>
    %16 = tpu.matmul %15, %14, %cst_14 {dimension_numbers = #tpu.dot_dimension_numbers<[1], [0], [0], [1], [0, 0, 1, 1], [], []>} : vector<2x24xf32>, vector<24x8xf32>, vector<2x8xf32> -> vector<2x8xf32>
    %c0_15 = arith.constant 0 : index
    %c0_16 = arith.constant 0 : index
    %17 = vector.load %arg7[%c0_15, %c0_16] : memref<2x1xf32, #tpu.memory_space<vmem>>, vector<2x1xf32>
    %18 = vector.broadcast %17 : vector<2x1xf32> to vector<2x8xf32>
    %19 = arith.addf %16, %18 : vector<2x8xf32>
    %c0_17 = arith.constant 0 : index
    %c0_18 = arith.constant 0 : index
    %20 = vector.load %arg8[%c0_17, %c0_18] : memref<2x8xf32, #tpu.memory_space<vmem>>, vector<2x8xf32>
    tpu.vector_store %arg8[%c0_17, %c0_18], %19 {strides = array<i32>} : memref<2x8xf32, #tpu.memory_space<vmem>>, vector<2x8xf32>,
    return
  }
  func.func @transform_0(%arg0: i32) -> (i32, i32) {
    %c0_i32 = arith.constant 0 : i32
    %c0_i32_0 = arith.constant 0 : i32
    return %c0_i32, %arg0 : i32, i32
  }
  func.func @transform_1(%arg0: i32) -> (i32, i32) {
    %c0_i32 = arith.constant 0 : i32
    %c0_i32_0 = arith.constant 0 : i32
    %c0_i32_1 = arith.constant 0 : i32
    return %c0_i32, %c0_i32_0 : i32, i32
  }
  func.func @transform_2(%arg0: i32) -> (i32, i32) {
    %c0_i32 = arith.constant 0 : i32
    %c0_i32_0 = arith.constant 0 : i32
    %c0_i32_1 = arith.constant 0 : i32
    return %c0_i32, %c0_i32_0 : i32, i32
  }
  func.func @transform_3(%arg0: i32) -> (i32, i32) {
    %c0_i32 = arith.constant 0 : i32
    %c0_i32_0 = arith.constant 0 : i32
    %c0_i32_1 = arith.constant 0 : i32
    return %c0_i32, %c0_i32_0 : i32, i32
  }
  func.func @transform_4(%arg0: i32) -> (i32, i32) {
    %c0_i32 = arith.constant 0 : i32
    %c0_i32_0 = arith.constant 0 : i32
    %c0_i32_1 = arith.constant 0 : i32
    return %c0_i32, %c0_i32_0 : i32, i32
  }
  func.func @transform_5(%arg0: i32) -> (i32, i32) {
    %c0_i32 = arith.constant 0 : i32
    %c0_i32_0 = arith.constant 0 : i32
    %c0_i32_1 = arith.constant 0 : i32
    return %c0_i32, %c0_i32_0 : i32, i32
  }
  func.func @transform_6(%arg0: i32) -> (i32, i32) {
    %c0_i32 = arith.constant 0 : i32
    %c0_i32_0 = arith.constant 0 : i32
    %c0_i32_1 = arith.constant 0 : i32
    return %c0_i32, %c0_i32_0 : i32, i32
  }
  func.func @transform_7(%arg0: i32) -> (i32, i32) {
    %c0_i32 = arith.constant 0 : i32
    %c0_i32_0 = arith.constant 0 : i32
    return %c0_i32, %arg0 : i32, i32
  }
}

</mosaic_0001>

<bundles_post_ra>
// kernel: tpu_custom_call.1
= control target key start
LH: loop header
LB: loop body
LE: loop exit
PB: predicated region body
PF: predicated region fallthrough
CT: control target
= control target key end

     0   :  { %vm59_vm0 = vcmask 1043456   ;;  %v441_v2 = vmov 0.0   ;;  %vm442_vm1 = vmmov 0   ;;  %vm49_vm2 = vcmask 31744   ;;  %s561_s0 = inlined_call_operand.vmem [shape: f32[4,8], index: 0, kind: input, shape index: {}]   ;;  %s562_s1 = inlined_call_operand.vmem [shape: f32[24,4], index: 1, kind: input, shape index: {}]   ;;  %s563_s2 = inlined_call_operand.vmem [shape: f32[24,1], index: 2, kind: input, shape index: {}]   ;;  %s564_s3 = inlined_call_operand.vmem [shape: f32[24,24], index: 3, kind: input, shape index: {}]   ;;  %s565_s4 = inlined_call_operand.vmem [shape: f32[24,1], index: 4, kind: input, shape index: {}]   ;;  %s566_s5 = inlined_call_operand.vmem [shape: f32[2,24], index: 5, kind: input, shape index: {}]   ;;  %s567_s6 = inlined_call_operand.vmem [shape: f32[2,1], index: 6, kind: input, shape index: {}]   ;;  %s568_s7 = inlined_call_operand.hbm [shape: f32[2,8], index: 7, kind: output, shape index: {}]  }
   0x1   :  { %v27_v0 = vld [vmem:[%s561_s0] sm:$0xf]  ;;  %378 = vmatprep.subr.mxu0 %v441_v2  ;;  %380 = vmatprep.mubr.msk.f32.mxu0 %vm442_vm1, %v441_v2  ;;  %v33_v3 = vld [vmem:[%s563_s2 + $0x10] sm:$0xff]  ;;  %v443_v4 = vmov 0   ;;  %v29_v6 = vld [vmem:[%s562_s1 + $0x8] sm:$0xff] }
   0x2   :  { %v28_v1 = vld [vmem:[%s562_s1] sm:$0xff]  ;;  %379 = vmatpush3.msk.msra.mxu0 %vm59_vm0, %v27_v0  ;;  %417 = vset.pattern.permute.xlu0 %v443_v4  ;;  %v32_v7 = vld [vmem:[%s563_s2 + $0x8] sm:$0xff] }
   0x3   :  { %v31_v5 = vld [vmem:[%s563_s2] sm:$0xff]  ;;  %381 = vmatmul.mubr.msk.f32.vlgmr.msra.gmra.mxu0 %vm49_vm2, %v28_v1  ;;  %46 = vperm.xlu0 %417, %v33_v3  }
   0x4   :  { %383 = vmatprep.mubr.msk.f32.mxu0 %vm442_vm1, %v441_v2  ;;  %418 = vset.pattern.permute.xlu1 %v443_v4 }
   0x5   :  { %12 = vsyncpa [#allocation3], 0  ;;  %36 = vperm.xlu1 %418, %v31_v5   ;;  %389 = vmatprep.subr.mxu1 %v441_v2  ;;  %v151_v8 = vld [vmem:[%s565_s4 + $0x10] sm:$0xff]  ;;  %v150_v10 = vld [vmem:[%s565_s4 + $0x8] sm:$0xff]  ;;  %vm167_vm3 = vcmask 195584   ;;  %s444_s25 = smov [#allocation2]  }
   0x6   :  { %395 = vmatprep.mubr.msk.f32.mxu1 %vm442_vm1, %v441_v2  ;;  %404 = vmatprep.subr.mxu0 %v441_v2  ;;  %v30_v9 = vld [vmem:[%s562_s1 + $0x10] sm:$0xff]  ;;  %v149_v11 = vld [vmem:[%s565_s4] sm:$0xff]  ;;  %v147_v29 = vld [vmem:[%s564_s3 + $0x8] sm:$0xff]  ;;  %s348_s26 = sshll.u32 %s444_s25, 4  ;;  %vm340_vm4 = vcmask 58368   ;;  %s349_s26 = int_to_ptr.vmem [resolvable:$true] %s348_s26 }
   0x7   :  { %384 = vmatmul.mubr.msk.f32.gmra.mxu0 %vm49_vm2, %v29_v6  ;;  %41 = vperm.xlu0 %417, %v32_v7   ;;  %v261_v12 = vld [vmem:[%s567_s6] sm:$0x3]  ;;  %v148_v30 = vld [vmem:[%s564_s3 + $0x10] sm:$0xff]  ;;  %s419_s27 = scalar_lea.vmem %s349_s26, 32  ;;  %p424_p1 = scmp.lt.s32.totalorder %s349_s26, %s349_s26 }
   0x8   :  { %386 = vmatprep.mubr.msk.f32.mxu0 %vm442_vm1, %v441_v2  ;;  %v146_v28 = vld [vmem:[%s564_s3] sm:$0xff]  ;;  %p420_p0 = scmp.ne.s32.totalorder %s349_s26, %s419_s27  ;;  %p425_p2 = scmp.lt.s32.totalorder %s419_s27, %s419_s27 }
   0x9   :  { %164 = vperm.xlu1 %418, %v151_v8   ;;  %v260_v46 = vld [vmem:[%s566_s5] sm:$0x3] }
   0xa   :  { %p426_p3 = por %p425_p2, %p424_p1 }
   0xb   :  { %387 = vmatmul.mubr.msk.f32.gmra.mxu0 %vm49_vm2, %v30_v9  ;;  %159 = vperm.xlu0 %417, %v150_v10  }
   0xc   :  { %410 = vmatprep.mubr.msk.f32.mxu0 %vm442_vm1, %v441_v2  ;;  %p427_p4 = pnand %p426_p3, %p420_p0 }
   0xd   :  { %154 = vperm.xlu1 %418, %v149_v11  }
   0xf   :  { %264 = vperm.xlu0 %417, %v261_v12  }
  0x7e   :  { %v47_v14 = vpop.permute.xlu0 %46 }
  0x80   :  { %v37_v18 = vpop.permute.xlu1 %36 }
  0x82   :  { %v42_v19 = vpop.permute.xlu0 %41 }
  0x84   :  { %v165_v33 = vpop.permute.xlu1 %164 }
  0x86   :  { %v160_v36 = vpop.permute.xlu0 %159 }
  0x88   :  { %v155_v40 = vpop.permute.xlu1 %154 }
  0x8a   :  { %v265_v47 = vpop.permute.xlu0 %264 }
  0xc3   :  { %v129_v13 = vpop.f32.mrf.mxu0 }
  0xc4   :  { %v130_v24 = vadd.f32 %v129_v13, %v37_v18 }
  0xc5   :  { %v382_v15 = vpop.f32.mrf.mxu0 }
  0xc6   :  { %v143_v27 = vmax.f32 %v130_v24, 0.0 }
  0xc7   :  { %v134_v16 = vpop.f32.mrf.mxu0 }
  0xc8   :  { %v135_v21 = vadd.f32 %v134_v16, %v42_v19 }
  0xc9   :  { %v385_v17 = vpop.f32.mrf.mxu0 }
  0xca   :  { %v144_v26 = vmax.f32 %v135_v21, 0.0 }
  0xcb   :  { %v139_v20 = vpop.f32.mrf.mxu0 }
  0xcc   :  { %v140_v22 = vadd.f32 %v139_v20, %v47_v14 }
  0xcd   :  { %v388_v23 = vpop.f32.mrf.mxu0 }
  0xce   :  { %v145_v25 = vmax.f32 %v140_v22, 0.0 }
  0xd0   :  { %390 = vmatpush3.msra.mxu1 %v145_v25 }
  0xd1   :  { %391 = vmatprep.subr.mxu1 %v441_v2 }
  0xd2   :  { %392 = vmatpush3.msra.mxu1 %v144_v26 }
  0xd3   :  { %393 = vmatprep.subr.mxu1 %v441_v2 }
  0xd4   :  { %394 = vmatpush3.msra.mxu1 %v143_v27 }
  0xd5   :  { %396 = vmatmul.mubr.msk.f32.vlgmr.msra.gmra.mxu1 %vm167_vm3, %v146_v28 }
  0xd6   :  { %398 = vmatprep.mubr.msk.f32.mxu1 %vm442_vm1, %v441_v2 }
  0xd9   :  { %399 = vmatmul.mubr.msk.f32.gmra.mxu1 %vm167_vm3, %v147_v29 }
  0xda   :  { %401 = vmatprep.mubr.msk.f32.mxu1 %vm442_vm1, %v441_v2 }
  0xdd   :  { %402 = vmatmul.mubr.msk.f32.gmra.mxu1 %vm167_vm3, %v148_v30 }
 0x195   :  { %v243_v31 = vpop.f32.mrf.mxu1 }
 0x196   :  { %v244_v42 = vadd.f32 %v243_v31, %v155_v40 }
 0x197   :  { %v397_v32 = vpop.f32.mrf.mxu1 }
 0x198   :  { %v257_v45 = vmax.f32 %v244_v42, 0.0 }
 0x199   :  { %v248_v34 = vpop.f32.mrf.mxu1 }
 0x19a   :  { %v249_v38 = vadd.f32 %v248_v34, %v160_v36 }
 0x19b   :  { %v400_v35 = vpop.f32.mrf.mxu1 }
 0x19c   :  { %v258_v44 = vmax.f32 %v249_v38, 0.0 }
 0x19d   :  { %v253_v37 = vpop.f32.mrf.mxu1 }
 0x19e   :  { %v254_v39 = vadd.f32 %v253_v37, %v165_v33 }
 0x19f   :  { %v403_v41 = vpop.f32.mrf.mxu1 }
 0x1a0   :  { %v259_v43 = vmax.f32 %v254_v39, 0.0 }
 0x1a2   :  { %405 = vmatpush3.msra.mxu0 %v259_v43 }
 0x1a3   :  { %406 = vmatprep.subr.mxu0 %v441_v2 }
 0x1a4   :  { %407 = vmatpush3.msra.mxu0 %v258_v44 }
 0x1a5   :  { %408 = vmatprep.subr.mxu0 %v441_v2 }
 0x1a6   :  { %409 = vmatpush3.msra.mxu0 %v257_v45 }
 0x1a7   :  { %411 = vmatmul.mubr.msk.f32.vlgmr.msra.gmra.mxu0 %vm167_vm3, %v260_v46 }
 0x267   :  { %v336_v48 = vpop.f32.mrf.mxu0 }
 0x268   :  { %v337_v49 = vadd.f32 %v336_v48, %v265_v47 }
 0x269   :  { %v412_v50 = vpop.f32.mrf.mxu0 }
 0x26a   :  { %341 = vst.msk [vmem:[#allocation2] sm:$0x3] %vm340_vm4, %v337_v49 }
 0x26b   :  { %430 = shalt.err (!%p427_p4)
}
 0x26c   :  { %351 = dma.vmem_to_hbm [thread:$0]  %s349_s26, 32, %s568_s7, [#allocation3]  }
 0x26d   :  { %439 = dma.done.wait [#allocation3], 32  }
 0x26e   :  { %440 = vsyncadd [#allocation3], 4294967264 }
 0x26f   :  { %355 = vsyncpa [#allocation3], 1 }

</bundles_post_ra>
